<compile_context>
chip_gen: v7x
topology: tpu7x:2x2x1
jax: 0.10.0
libtpu: 0.0.40
codegen_flags: <defaults>
</compile_context>

<pallas_src>
import functools

import jax
import jax.numpy as jnp
from jax.experimental import pallas as pl
from jax.experimental.pallas import tpu as pltpu


def _mlp_kernel(x_ref, w1_ref, b1_ref, w2_ref, b2_ref, o_ref):
    # Two MXU matmuls + EUP tanh; everything for one batch tile is in VMEM.
    x = x_ref[...]
    h = jnp.dot(x, w1_ref[...], preferred_element_type=jnp.float32) + b1_ref[...]
    h = jnp.tanh(h)  # f32 on the EUP
    out = jnp.dot(h.astype(w2_ref.dtype), w2_ref[...],
                  preferred_element_type=jnp.float32) + b2_ref[...]
    o_ref[...] = out.astype(o_ref.dtype)


def _round_up(n, m):
    return ((n + m - 1) // m) * m


# Cap chosen so per-grid-step fixed overhead (~0.35 us) is well amortized
# while a single x tile stays tiny in VMEM (~0.5 MiB f32 at D=32).
_MAX_TILE = 4096


@functools.partial(jax.jit, static_argnames=("batch_tile",))
def nonlinearnet_forward(x, w1, b1, w2, b2, *, batch_tile=None):
    """Forward pass of NonLinearNet.

    x:  (B, D)        w1: (D, D+1)   b1: (1, D+1)
    w2: (D+1, 2)      b2: (1, 2)
    Returns logits of shape (B, 2) in float32.
    """
    B, D = x.shape
    H = w1.shape[1]
    C = w2.shape[1]

    # Tiny weight casts so the MXU sees a single input dtype; biases stay f32
    # and both matmuls accumulate in f32 regardless.
    w1 = w1.astype(x.dtype)
    w2 = w2.astype(x.dtype)
    b1 = b1.astype(jnp.float32)
    b2 = b2.astype(jnp.float32)

    # Sublane alignment for the batch axis of the (tile, D) block.
    sublane = 16 if x.dtype == jnp.bfloat16 else 8

    if batch_tile is None:
        if B <= _MAX_TILE:
            # Whole batch in one block: one grid step, zero ragged handling.
            batch_tile = _round_up(B, sublane)
        else:
            # Keep >= 2 balanced grid steps so v7x's two TensorCores both get
            # work along the "parallel" batch axis; steps stay ~_MAX_TILE rows.
            n_steps = max(2, pl.cdiv(B, _MAX_TILE))
            batch_tile = _round_up(pl.cdiv(B, n_steps), sublane)
    else:
        batch_tile = _round_up(int(batch_tile), sublane)

    # No wrapper-side padding: Pallas masks the ragged last block (OOB input
    # rows are undefined but only feed output rows that are dropped on store).
    grid = (pl.cdiv(B, batch_tile),)

    out = pl.pallas_call(
        _mlp_kernel,
        out_shape=jax.ShapeDtypeStruct((B, C), jnp.float32),
        grid_spec=pl.GridSpec(
            grid=grid,
            in_specs=[
                pl.BlockSpec((batch_tile, D), lambda i: (i, 0)),  # x tile
                pl.BlockSpec((D, H), lambda i: (0, 0)),           # w1 (resident)
                pl.BlockSpec((1, H), lambda i: (0, 0)),           # b1 (resident)
                pl.BlockSpec((H, C), lambda i: (0, 0)),           # w2 (resident)
                pl.BlockSpec((1, C), lambda i: (0, 0)),           # b2 (resident)
            ],
            out_specs=pl.BlockSpec((batch_tile, C), lambda i: (i, 0)),
        ),
        compiler_params=pltpu.CompilerParams(
            dimension_semantics=("parallel",),  # megacore-shardable on v7x
        ),
    )(x, w1, b1, w2, b2)

    return out


def _reference_forward(x, w1, b1, w2, b2):
    h = jnp.tanh(x @ w1 + b1)
    return h @ w2 + b2


def _init_params(key, dimensions, dtype=jnp.float32):
    """Deterministic init mirroring nn.Linear's default U(-1/sqrt(fan_in), 1/sqrt(fan_in))."""
    d_in1, d_out1 = dimensions, dimensions + 1
    d_in2, d_out2 = dimensions + 1, 2
    k1, k2, k3, k4 = jax.random.split(key, 4)
    bound1 = 1.0 / jnp.sqrt(d_in1)
    bound2 = 1.0 / jnp.sqrt(d_in2)
    w1 = jax.random.uniform(k1, (d_in1, d_out1), dtype, -bound1, bound1)
    b1 = jax.random.uniform(k2, (1, d_out1), dtype, -bound1, bound1)
    w2 = jax.random.uniform(k3, (d_in2, d_out2), dtype, -bound2, bound2)
    b2 = jax.random.uniform(k4, (1, d_out2), dtype, -bound2, bound2)
    return w1, b1, w2, b2


if __name__ == "__main__":
    key = jax.random.PRNGKey(0)
    kx, kp, kx2 = jax.random.split(key, 3)

    dimensions = 32                      # hidden = dimensions + 1 = 33, classes = 2
    w1, b1, w2, b2 = _init_params(kp, dimensions)

    # Small case: whole batch is a single block, grid=(1,).
    batch = 16
    x = jax.random.normal(kx, (batch, dimensions), jnp.float32)
    out = jax.block_until_ready(nonlinearnet_forward(x, w1, b1, w2, b2))
    ref = _reference_forward(x, w1, b1, w2, b2)
    assert out.shape == (batch, 2), out.shape
    assert jnp.allclose(out, ref, atol=1e-5, rtol=1e-5), "mismatch vs reference (small)"

    # Larger case: B=1000 fits in one block (tile=1000), no padding anywhere.
    batch2 = 1000
    x2 = jax.random.normal(kx2, (batch2, dimensions), jnp.float32)
    out2 = jax.block_until_ready(nonlinearnet_forward(x2, w1, b1, w2, b2))
    ref2 = _reference_forward(x2, w1, b1, w2, b2)
    assert out2.shape == (batch2, 2), out2.shape
    assert jnp.allclose(out2, ref2, atol=1e-5, rtol=1e-5), "mismatch vs reference (1000)"

    # Forced-small tile to exercise multi-step grid + ragged last block
    # (1000 = 3*256 + 232; Pallas masks the OOB tail, no wrapper pad/slice).
    out3 = jax.block_until_ready(
        nonlinearnet_forward(x2, w1, b1, w2, b2, batch_tile=256))
    assert out3.shape == (batch2, 2), out3.shape
    assert jnp.allclose(out3, ref2, atol=1e-5, rtol=1e-5), "mismatch vs reference (ragged)"

    print("KERNEL_OK")
</pallas_src>

<mosaic_0001>
module attributes {stable_mosaic.version = 11 : i64} {
  func.func @_mlp_kernel(%arg0: i32, %arg1: memref<16x32xf32, #tpu.memory_space<vmem>>, %arg2: memref<32x33xf32, #tpu.memory_space<vmem>>, %arg3: memref<1x33xf32, #tpu.memory_space<vmem>>, %arg4: memref<33x2xf32, #tpu.memory_space<vmem>>, %arg5: memref<1x2xf32, #tpu.memory_space<vmem>>, %arg6: memref<16x2xf32, #tpu.memory_space<vmem>>) attributes {dimension_semantics = [#tpu.dimension_semantics<parallel>], iteration_bounds = array<i64: 1>, scalar_prefetch = 0 : i64, scratch_operands = 0 : i64, tpu.core_type = #tpu.core_type<tc>, window_params = [{transform_indices = @transform_0, window_bounds = array<i64: 16, 32>}, {pipeline_mode = #tpu.pipeline_mode<synchronous>, transform_indices = @transform_1, window_bounds = array<i64: 32, 33>}, {pipeline_mode = #tpu.pipeline_mode<synchronous>, transform_indices = @transform_2, window_bounds = array<i64: 1, 33>}, {pipeline_mode = #tpu.pipeline_mode<synchronous>, transform_indices = @transform_3, window_bounds = array<i64: 33, 2>}, {pipeline_mode = #tpu.pipeline_mode<synchronous>, transform_indices = @transform_4, window_bounds = array<i64: 1, 2>}, {transform_indices = @transform_5, window_bounds = array<i64: 16, 2>}]} {
    %c0 = arith.constant 0 : index
    %c0_0 = arith.constant 0 : index
    %0 = vector.load %arg1[%c0, %c0_0] : memref<16x32xf32, #tpu.memory_space<vmem>>, vector<16x32xf32>
    %c0_1 = arith.constant 0 : index
    %c0_2 = arith.constant 0 : index
    %1 = vector.load %arg2[%c0_1, %c0_2] : memref<32x33xf32, #tpu.memory_space<vmem>>, vector<32x33xf32>
    %cst = arith.constant dense<0.000000e+00> : vector<16x33xf32>
    %2 = tpu.matmul %0, %1, %cst {dimension_numbers = #tpu.dot_dimension_numbers<[1], [0], [0], [1], [0, 0, 1, 1], [], []>} : vector<16x32xf32>, vector<32x33xf32>, vector<16x33xf32> -> vector<16x33xf32>
    %c0_3 = arith.constant 0 : index
    %c0_4 = arith.constant 0 : index
    %3 = vector.load %arg3[%c0_3, %c0_4] : memref<1x33xf32, #tpu.memory_space<vmem>>, vector<1x33xf32>
    %4 = vector.broadcast %3 : vector<1x33xf32> to vector<16x33xf32>
    %5 = arith.addf %2, %4 : vector<16x33xf32>
    %6 = math.tanh %5 : vector<16x33xf32>
    %c0_5 = arith.constant 0 : index
    %c0_6 = arith.constant 0 : index
    %7 = vector.load %arg4[%c0_5, %c0_6] : memref<33x2xf32, #tpu.memory_space<vmem>>, vector<33x2xf32>
    %cst_7 = arith.constant dense<0.000000e+00> : vector<16x2xf32>
    %8 = tpu.matmul %6, %7, %cst_7 {dimension_numbers = #tpu.dot_dimension_numbers<[1], [0], [0], [1], [0, 0, 1, 1], [], []>} : vector<16x33xf32>, vector<33x2xf32>, vector<16x2xf32> -> vector<16x2xf32>
    %c0_8 = arith.constant 0 : index
    %c0_9 = arith.constant 0 : index
    %9 = vector.load %arg5[%c0_8, %c0_9] : memref<1x2xf32, #tpu.memory_space<vmem>>, vector<1x2xf32>
    %10 = vector.broadcast %9 : vector<1x2xf32> to vector<16x2xf32>
    %11 = arith.addf %8, %10 : vector<16x2xf32>
    %c0_10 = arith.constant 0 : index
    %c0_11 = arith.constant 0 : index
    %12 = vector.load %arg6[%c0_10, %c0_11] : memref<16x2xf32, #tpu.memory_space<vmem>>, vector<16x2xf32>
    tpu.vector_store %arg6[%c0_10, %c0_11], %11 {strides = array<i32>} : memref<16x2xf32, #tpu.memory_space<vmem>>, vector<16x2xf32>,
    return
  }
  func.func @transform_0(%arg0: i32) -> (i32, i32) {
    %c0_i32 = arith.constant 0 : i32
    %c0_i32_0 = arith.constant 0 : i32
    return %arg0, %c0_i32 : i32, i32
  }
  func.func @transform_1(%arg0: i32) -> (i32, i32) {
    %c0_i32 = arith.constant 0 : i32
    %c0_i32_0 = arith.constant 0 : i32
    %c0_i32_1 = arith.constant 0 : i32
    return %c0_i32, %c0_i32_0 : i32, i32
  }
  func.func @transform_2(%arg0: i32) -> (i32, i32) {
    %c0_i32 = arith.constant 0 : i32
    %c0_i32_0 = arith.constant 0 : i32
    %c0_i32_1 = arith.constant 0 : i32
    return %c0_i32, %c0_i32_0 : i32, i32
  }
  func.func @transform_3(%arg0: i32) -> (i32, i32) {
    %c0_i32 = arith.constant 0 : i32
    %c0_i32_0 = arith.constant 0 : i32
    %c0_i32_1 = arith.constant 0 : i32
    return %c0_i32, %c0_i32_0 : i32, i32
  }
  func.func @transform_4(%arg0: i32) -> (i32, i32) {
    %c0_i32 = arith.constant 0 : i32
    %c0_i32_0 = arith.constant 0 : i32
    %c0_i32_1 = arith.constant 0 : i32
    return %c0_i32, %c0_i32_0 : i32, i32
  }
  func.func @transform_5(%arg0: i32) -> (i32, i32) {
    %c0_i32 = arith.constant 0 : i32
    %c0_i32_0 = arith.constant 0 : i32
    return %arg0, %c0_i32 : i32, i32
  }
}

</mosaic_0001>

<bundles_post_ra>
// kernel: nonlinearnet_forward.1
= control target key start
LH: loop header
LB: loop body
LE: loop exit
PB: predicated region body
PF: predicated region fallthrough
CT: control target
= control target key end

     0   :  { %10 = vsyncpa [#allocation3], 0  ;;  %s328_s18 = smov [#allocation2]   ;;  %s412_s0 = inlined_call_operand.hbm [shape: f32[16,32], index: 0, kind: input, shape index: {}]   ;;  %s413_s1 = inlined_call_operand.vmem [shape: f32[32,33], index: 1, kind: input, shape index: {}]   ;;  %s414_s2 = inlined_call_operand.vmem [shape: f32[1,33], index: 2, kind: input, shape index: {}]   ;;  %s415_s3 = inlined_call_operand.vmem [shape: f32[33,2], index: 3, kind: input, shape index: {}]   ;;  %s416_s4 = inlined_call_operand.vmem [shape: f32[1,2], index: 4, kind: input, shape index: {}]   ;;  %s417_s5 = inlined_call_operand.vmem [shape: f32[16,2], index: 5, kind: output, shape index: {}]  }
   0x1   :  { %s16_s19 = sshll.u32 %s328_s18, 4  ;;  %s304_s22 = scalar_lea.hbm %s412_s0, 256  ;;  %s17_s19 = int_to_ptr.vmem [resolvable:$true] %s16_s19 }
   0x2   :  { %p305_p0 = scmp.ne.s32.totalorder %s412_s0, %s304_s22  ;;  %p308_p1 = scmp.lt.u32.totalorder %s304_s22, %s412_s0 }
   0x4   :  { %p310_p2 = pnand %p308_p1, %p305_p0 }
   0x6   :  { %313 = shalt.err (!%p310_p2)
}
   0x7   :  { %s314_s27 = scalar_lea.vmem %s17_s19, 256  ;;  %p319_p4 = scmp.lt.s32.totalorder %s17_s19, %s17_s19 }
   0x8   :  { %p315_p3 = scmp.ne.s32.totalorder %s17_s19, %s314_s27  ;;  %p320_p5 = scmp.lt.s32.totalorder %s314_s27, %s314_s27 }
   0xa   :  { %p321_p6 = por %p320_p5, %p319_p4 }
   0xc   :  { %p322_p7 = pnand %p321_p6, %p315_p3 }
   0xe   :  { %325 = shalt.err (!%p322_p7)
}
   0xf   :  { %s329_s28 = smov 128   ;;  %s330_s29 = smov 8  }
  0x10   :  { %22 = dma.hbm_to_vmem [thread:$0]  %s412_s0, 256, %s17_s19, [#allocation3], %s329_s28, %s329_s28, %s330_s29  }
  0x11   :  { %326 = dma.done.wait [#allocation3], 256  }
  0x12   :  { %327 = vsyncadd [#allocation3], 4294967040  ;;  %vm47_vm0 = vcmask 261120   ;;  %v36_v0 = vld [vmem:[%s413_s1] sm:$0xff]  ;;  %v37_v1 = vld [vmem:[%s413_s1 + $0x8] sm:$0xff]  ;;  %vm150_vm1 = vcmask 1040384  }
  0x13   :  { %v38_v2 = vld [vmem:[%s413_s1 + $0x10] sm:$0xff]  ;;  %v281_v3 = vpack.c.bf16 %v37_v1, %v36_v0  ;;  %v39_v4 = vld [vmem:[%s413_s1 + $0x18] sm:$0xff]  ;;  %v34_v5 = vld [vmem:[#allocation2] sm:$0xff]  ;;  %vm143_vm2 = vcmask 269312   ;;  %vm229_vm3 = vcmask 15360  }
  0x14   :  { %v285_v6 = vpack.c.bf16 %v39_v4, %v38_v2  ;;  %265 = vmatprep.mubr.msk.f32.mxu0 %vm47_vm0, %v34_v5  ;;  %v35_v7 = vld [vmem:[#allocation2 + $0x8] sm:$0xff]  ;;  %v131_v8 = vld [vmem:[%s415_s3] sm:$0xff]  ;;  %v133_v11 = vld [vmem:[%s415_s3 + $0x10] sm:$0xff] }
  0x15   :  { %282 = vmatprep.subr.bf16.mxu0 %v281_v3  ;;  %v132_v9 = vld [vmem:[%s415_s3 + $0x8] sm:$0xff]  ;;  %v134_v12 = vld [vmem:[%s415_s3 + $0x18] sm:$0xff]  ;;  %v135_v14 = vld [vmem:[%s415_s3 + $0x20] sm:$0x1] }
  0x16   :  { %284 = vmatpush3.bf16.msra.mxu0 %v281_v3  ;;  %v289_v10 = vpack.c.bf16 %v132_v9, %v131_v8  ;;  %v293_v13 = vpack.c.bf16 %v134_v12, %v133_v11  ;;  %v237_v15 = vld [vmem:[%s414_s2] ss:$0 sm:$0xff] }
  0x17   :  { %286 = vmatprep.subr.bf16.mxu0 %v285_v6  ;;  %v240_v22 = vld [vmem:[%s416_s4] ss:$0 sm:$0xff] }
  0x18   :  { %290 = vmatprep.subr.bf16.mxu1 %v289_v10 }
  0x19   :  { %292 = vmatpush3.bf16.msra.mxu1 %v289_v10 }
  0x1a   :  { %288 = vmatpush3.bf16.msra.mxu0 %v285_v6  ;;  %294 = vmatprep.subr.bf16.mxu1 %v293_v13 }
  0x1d   :  { %266 = vmatmul.mubr.msk.f32.vlgmr.msra.gmra.mrb[0].mxu0 %vm47_vm0, %v35_v7  ;;  %296 = vmatpush3.bf16.msra.mxu1 %v293_v13 }
  0x1e   :  { %276 = vmatprep.subr.msk.mxu1 %vm150_vm1, %v135_v14 }
  0x21   :  { %277 = vmatpush3.msk.msra.mxu1 %vm150_vm1, %v135_v14 }
  0xf0   :  { %v267_v16 = vpop.f32.mrb[0].mxu0 }
  0xf1   :  { %v126_v17 = vadd.f32 %v267_v16, %v237_v15  ;;  %v120_v18 = vpop.f32.mrb[1].mxu0 }
  0xf2   :  { %v121_v19 = vadd.f32 %v237_v15, %v120_v18 }
  0xf4   :  { %300 = vtanh.f32 %v121_v19 }
  0xf5   :  { %302 = vtanh.f32 %v126_v17 }
  0xfe   :  { %v301_v20 = vpop.eup %300 }
  0xff   :  { %v303_v21 = vpop.eup %302  ;;  %278 = vmatprep.mubr.msk.f32.mxu1 %vm143_vm2, %v301_v20 }
 0x100   :  { %279 = vmatmul.mubr.msk.f32.vlgmr.msra.gmra.mrb[0].mxu1 %vm143_vm2, %v303_v21 }
 0x1d3   :  { %v280_v23 = vpop.f32.mrb[0].mxu1 }
 0x1d4   :  { %v226_v24 = vadd.f32 %v280_v23, %v240_v22  ;;  %v220_v25 = vpop.f32.mrb[1].mxu1 }
 0x1d5   :  { %v221_v26 = vadd.f32 %v240_v22, %v220_v25 }
 0x1d6   :  { %231 = vst.msk [vmem:[%s417_s5 + $0x8] sm:$0xff] %vm229_vm3, %v226_v24 }
 0x1d7   :  { %230 = vst.msk [vmem:[%s417_s5] sm:$0xff] %vm229_vm3, %v221_v26 }
 0x1d8   :  { %236 = vsyncpa [#allocation3], 1 }

</bundles_post_ra>
